<compile_context>
chip_gen: v7x
topology: tpu7x:2x2x1
jax: 0.10.0
libtpu: 0.0.40
codegen_flags: <defaults>
</compile_context>

<pallas_src>
import functools

import jax
import jax.numpy as jnp
from jax.experimental import pallas as pl
from jax.experimental.pallas import tpu as pltpu

TEMPERATURE = 2.0
# TODO(synk): args.distill_loss_weight is never defined in the reference
# argparse setup; fixed to a constant here.
DISTILL_LOSS_WEIGHT = 0.5

ROW_TILE = 256          # M tile (rows) for the projection; 512 is fine on v7x
MAX_K_TILE = 512        # hidden (reduction) tile
MAX_V_TILE = 1024       # vocab tile for the projection
VMEM_LIMIT_BYTES = 32 * 1024 * 1024   # explicit scoped-VMEM budget (v5e default is 16 MiB)
NEG_PAD = -1e30         # bias value for padded vocab columns (excluded from softmax)


def _round_up(x, m):
    return ((x + m - 1) // m) * m


def _pick_tile(full, candidates):
    for c in candidates:
        if full % c == 0:
            return c
    return full


# ------------------- projection (+ online softmax stats) --------------------
def _proj_kernel(x_ref, w_ref, b_ref, *refs, with_stats):
    """One (tm, tn) logits block: K-tiled bf16 MXU matmul with f32 accumulation.
    If with_stats, also maintains flash-style per-row (max, sumexp) across the
    vocab tiles so a cheap second pass can normalize the softmax."""
    if with_stats:
        logits_ref, m_ref, l_ref, acc_ref, m_scr, l_scr = refs
    else:
        logits_ref, acc_ref = refs

    j = pl.program_id(1)
    k = pl.program_id(2)
    nj = pl.num_programs(1)
    nk = pl.num_programs(2)

    @pl.when(k == 0)
    def _():
        acc_ref[...] = jnp.zeros_like(acc_ref)

    acc_ref[...] += jnp.dot(x_ref[...], w_ref[...],
                            preferred_element_type=jnp.float32)

    if with_stats:
        @pl.when(jnp.logical_and(k == nk - 1, j == 0))
        def _():
            m_scr[...] = jnp.full_like(m_scr, -jnp.inf)
            l_scr[...] = jnp.zeros_like(l_scr)

    @pl.when(k == nk - 1)
    def _():
        logits = acc_ref[...] + b_ref[...]
        logits_ref[...] = logits
        if with_stats:
            blk_max = jnp.max(logits, axis=-1, keepdims=True)
            m_new = jnp.maximum(m_scr[...], blk_max)
            l_scr[...] = (l_scr[...] * jnp.exp(m_scr[...] - m_new)
                          + jnp.sum(jnp.exp(logits - m_new), axis=-1,
                                    keepdims=True))
            m_scr[...] = m_new

    if with_stats:
        @pl.when(jnp.logical_and(k == nk - 1, j == nj - 1))
        def _():
            m_ref[...] = m_scr[...]
            l_ref[...] = l_scr[...]


def _softmax_norm_kernel(logits_ref, m_ref, l_ref, probs_ref):
    # Exact division (not approx reciprocal) for the *returned* probabilities.
    probs_ref[...] = jnp.exp(logits_ref[...] - m_ref[...]) / l_ref[...]


def linear_softmax_forward(x, w_bf, b, v_out, *, with_probs):
    """x: [N, H] f32; w_bf: [Hp, Vp] bf16 (pre-padded, pre-cast at init);
    b: [1, Vp] f32 (padded vocab columns hold NEG_PAD).
    Returns logits [N, v_out] f32 (and softmax probs over vocab if with_probs)."""
    N, H = x.shape
    Hp, Vp = w_bf.shape

    tm = min(ROW_TILE, _round_up(N, 8))
    Np = _round_up(N, tm)
    tk = _pick_tile(Hp, (MAX_K_TILE, 256, 128))
    tn = _pick_tile(Vp, (MAX_V_TILE, 512, 256, 128))

    x_bf = x.astype(jnp.bfloat16)
    if (Np, Hp) != (N, H):
        x_bf = jnp.zeros((Np, Hp), jnp.bfloat16).at[:N, :H].set(x_bf)

    grid = (Np // tm, Vp // tn, Hp // tk)
    in_specs = [
        pl.BlockSpec((tm, tk), lambda i, j, k: (i, k)),
        pl.BlockSpec((tk, tn), lambda i, j, k: (k, j)),
        pl.BlockSpec((1, tn), lambda i, j, k: (0, j)),
    ]
    logits_spec = pl.BlockSpec((tm, tn), lambda i, j, k: (i, j))
    stat_spec = pl.BlockSpec((tm, 1), lambda i, j, k: (i, 0))

    if with_probs:
        out_shape = (jax.ShapeDtypeStruct((Np, Vp), jnp.float32),
                     jax.ShapeDtypeStruct((Np, 1), jnp.float32),
                     jax.ShapeDtypeStruct((Np, 1), jnp.float32))
        out_specs = (logits_spec, stat_spec, stat_spec)
        scratch = [pltpu.VMEM((tm, tn), jnp.float32),
                   pltpu.VMEM((tm, 1), jnp.float32),
                   pltpu.VMEM((tm, 1), jnp.float32)]
    else:
        out_shape = jax.ShapeDtypeStruct((Np, Vp), jnp.float32)
        out_specs = logits_spec
        scratch = [pltpu.VMEM((tm, tn), jnp.float32)]

    proj = pl.pallas_call(
        functools.partial(_proj_kernel, with_stats=with_probs),
        out_shape=out_shape,
        grid_spec=pltpu.PrefetchScalarGridSpec(
            num_scalar_prefetch=0,
            grid=grid,
            in_specs=in_specs,
            out_specs=out_specs,
            scratch_shapes=scratch),
        compiler_params=pltpu.CompilerParams(
            dimension_semantics=("parallel", "arbitrary", "arbitrary"),
            vmem_limit_bytes=VMEM_LIMIT_BYTES),
    )

    if not with_probs:
        logits = proj(x_bf, w_bf, b)
        return logits[:N, :v_out]

    # TODO(synk): logits consumed only by the loss could be stored in bf16 to
    # halve that HBM pass; kept f32 here for numerical fidelity to the reference.
    logits, m_rows, l_rows = proj(x_bf, w_bf, b)

    probs = pl.pallas_call(
        _softmax_norm_kernel,
        out_shape=jax.ShapeDtypeStruct((Np, Vp), jnp.float32),
        grid_spec=pltpu.PrefetchScalarGridSpec(
            num_scalar_prefetch=0,
            grid=(Np // tm, Vp // tn),
            in_specs=[
                pl.BlockSpec((tm, tn), lambda i, j: (i, j)),
                pl.BlockSpec((tm, 1), lambda i, j: (i, 0)),
                pl.BlockSpec((tm, 1), lambda i, j: (i, 0)),
            ],
            out_specs=pl.BlockSpec((tm, tn), lambda i, j: (i, j))),
        compiler_params=pltpu.CompilerParams(
            dimension_semantics=("parallel", "parallel"),
            vmem_limit_bytes=VMEM_LIMIT_BYTES),
    )(logits, m_rows, l_rows)

    return logits[:N, :v_out], probs[:N, :v_out]


# ------------------------------ loss kernel ---------------------------------
def _loss_kernel(s_ref, t_ref, lab_ref, ce_ref, kl_ref,
                 sumexp_scr, labsum_scr, kl_scr):
    j = pl.program_id(1)
    nj = pl.num_programs(1)
    _, S, tv = s_ref.shape

    @pl.when(j == 0)
    def _():
        sumexp_scr[...] = jnp.zeros_like(sumexp_scr)
        labsum_scr[...] = jnp.zeros_like(labsum_scr)
        kl_scr[...] = jnp.zeros_like(kl_scr)

    inv_t = 1.0 / TEMPERATURE
    s = s_ref[0] * inv_t                                  # [S, tv]
    t = t_ref[0] * inv_t

    # `.softmax(1)` over the *sequence* axis, exactly as the PyTorch reference;
    # it is independent per (batch, vocab) column, so vocab tiling is exact.
    m_s = jnp.max(s, axis=0, keepdims=True)               # (1, tv)
    e_s = jnp.exp(s - m_s)
    sp = e_s / jnp.sum(e_s, axis=0, keepdims=True)        # (S, tv)

    # log(teacher softmax) computed analytically from the logits (cheap (1,tv)
    # log; avoids a full-tile log pass and the log(0) -> NaN hazard).
    m_t = jnp.max(t, axis=0, keepdims=True)
    log_denom_t = jnp.log(jnp.sum(jnp.exp(t - m_t), axis=0, keepdims=True))
    log_tp = (t - m_t) - log_denom_t                      # (S, tv)
    tp = jnp.exp(log_tp)

    # CrossEntropyLoss(sp.permute(0, 2, 1), labels): log_softmax over the vocab
    # (class) axis of the already-softmaxed probabilities.  sp is in [0, 1],
    # so the logsumexp over vocab needs no max-shift and accumulates per tile.
    sumexp_scr[...] += jnp.sum(jnp.exp(sp), axis=1, keepdims=True)     # (S, 1)
    col = jax.lax.broadcasted_iota(jnp.int32, (S, tv), 1) + j * tv
    onehot = (col == lab_ref[0]).astype(jnp.float32)                   # (S, tv)
    labsum_scr[...] += jnp.sum(onehot * sp, keepdims=True)             # (1, 1)

    # TODO(synk): the reference calls `self.kldivloss()(sp, tp)` (would raise);
    # we implement the clearly intended KLDivLoss(sp, tp), with sp (already
    # probabilities) passed literally as the "log-prob" input, as written.
    kl_scr[...] += jnp.sum(tp * (log_tp - sp), keepdims=True)          # (1, 1)

    @pl.when(j == nj - 1)
    def _():
        # per-batch CE contribution: sum_s (logsumexp_v - sp[s, label_s])
        ce_ref[0] = (jnp.sum(jnp.log(sumexp_scr[...]), keepdims=True)
                     - labsum_scr[...])
        kl_ref[0] = kl_scr[...]


def _loss_vocab_tile(V, S):
    # 2 logits inputs x 2 pipeline buffers x (S, tv) f32 must fit the scoped
    # VMEM budget on every generation.
    budget = 8 * 1024 * 1024
    cap = max(128, budget // (16 * S))
    for c in (2048, 1024, 512, 256, 128):
        if c <= cap and V % c == 0:
            return c
    # TODO(synk): V not a multiple of 128 falls back to the full vocab per
    # block (fine for small test vocabs; pad V for production sizes).
    return V


def distill_loss(student_logits, teacher_logits, labels):
    B, S, V = student_logits.shape
    tv = _loss_vocab_tile(V, S)
    labels3d = labels.astype(jnp.int32)[..., None]        # [B, S, 1]

    ce_b, kl_b = pl.pallas_call(
        _loss_kernel,
        out_shape=(jax.ShapeDtypeStruct((B, 1, 1), jnp.float32),
                   jax.ShapeDtypeStruct((B, 1, 1), jnp.float32)),
        grid_spec=pltpu.PrefetchScalarGridSpec(
            num_scalar_prefetch=0,
            grid=(B, V // tv),
            in_specs=[
                pl.BlockSpec((1, S, tv), lambda b, j: (b, 0, j)),
                pl.BlockSpec((1, S, tv), lambda b, j: (b, 0, j)),
                pl.BlockSpec((1, S, 1), lambda b, j: (b, 0, 0)),
            ],
            out_specs=(pl.BlockSpec((1, 1, 1), lambda b, j: (b, 0, 0)),
                       pl.BlockSpec((1, 1, 1), lambda b, j: (b, 0, 0))),
            scratch_shapes=[
                pltpu.VMEM((S, 1), jnp.float32),   # running sum(exp(sp)) over V
                pltpu.VMEM((1, 1), jnp.float32),   # running sum_s sp[s, label]
                pltpu.VMEM((1, 1), jnp.float32),   # running KL partial sum
            ],
        ),
        compiler_params=pltpu.CompilerParams(
            dimension_semantics=("parallel", "arbitrary"),
            vmem_limit_bytes=VMEM_LIMIT_BYTES),
    )(student_logits, teacher_logits, labels3d)

    w = DISTILL_LOSS_WEIGHT
    ce = jnp.sum(ce_b) / (B * S)
    kl = jnp.sum(kl_b) / B
    return ce * (1.0 - w) + kl * w


# ------------------------------ glue wrappers --------------------------------
def pack_linear_params(emb, w, b):
    """Pre-cast the projection weight to bf16 and pre-pad (H, V) to multiples
    of 128 ONCE at init time (avoids a per-forward HBM pad+cast of [H, V])."""
    H, V = w.shape
    Hp, Vp = _round_up(H, 128), _round_up(V, 128)
    w_bf = jnp.zeros((Hp, Vp), jnp.bfloat16).at[:H, :V].set(
        w.astype(jnp.bfloat16))
    b_pad = jnp.full((1, Vp), NEG_PAD, jnp.float32).at[:, :V].set(
        b.reshape(1, V).astype(jnp.float32))
    return (emb, w_bf, b_pad, V)


def model_forward(params, input_ids, attention_mask, *, with_probs):
    """Synthetic stand-in for the HF student/teacher models: embedding lookup
    (plain JAX gather) followed by the Pallas hidden->vocab projection."""
    emb, w_bf, b, v_out = params
    x = emb[input_ids] * attention_mask[..., None].astype(jnp.float32)  # [B,S,H]
    B, S, H = x.shape
    out = linear_softmax_forward(x.reshape(B * S, H), w_bf, b, v_out,
                                 with_probs=with_probs)
    if with_probs:
        logits, probs = out
        return logits.reshape(B, S, v_out), probs.reshape(B, S, v_out)
    return out.reshape(B, S, v_out)


def distiller_forward(student_params, teacher_params,
                      teacher_input_ids, teacher_attention_mask,
                      student_input_ids, student_attention_mask,
                      student_labels, test=False):
    """Mirrors Distiller.forward: returns (softmax(student_logits, dim=2), loss)."""
    student_logits, student_probs = model_forward(
        student_params, student_input_ids, student_attention_mask,
        with_probs=True)
    if test:
        return student_probs
    teacher_logits = model_forward(
        teacher_params, teacher_input_ids, teacher_attention_mask,
        with_probs=False)
    loss = distill_loss(student_logits, teacher_logits, student_labels)
    return student_probs, loss


# ---------------------------------- main -------------------------------------
if __name__ == "__main__":
    B, S, H, V, VOCAB_IN = 2, 8, 128, 384, 64

    key = jax.random.PRNGKey(0)
    ks = jax.random.split(key, 8)

    def make_params(k_emb, k_w):
        emb = 0.02 * jax.random.normal(k_emb, (VOCAB_IN, H), jnp.float32)
        w = 0.02 * jax.random.normal(k_w, (H, V), jnp.float32)
        b = jnp.zeros((V,), jnp.float32)
        return pack_linear_params(emb, w, b)

    student_params = make_params(ks[0], ks[1])
    teacher_params = make_params(ks[2], ks[3])

    teacher_input_ids = jax.random.randint(ks[4], (B, S), 0, VOCAB_IN)
    student_input_ids = jax.random.randint(ks[5], (B, S), 0, VOCAB_IN)
    teacher_attention_mask = jnp.ones((B, S), jnp.float32)
    student_attention_mask = jnp.ones((B, S), jnp.float32)
    student_labels = jax.random.randint(ks[6], (B, S), 0, V)

    probs, loss = distiller_forward(
        student_params, teacher_params,
        teacher_input_ids, teacher_attention_mask,
        student_input_ids, student_attention_mask,
        student_labels, test=False)

    jax.block_until_ready((probs, loss))
    assert probs.shape == (B, S, V)
    assert loss.shape == ()
    assert bool(jnp.isfinite(loss))
    assert bool(jnp.allclose(jnp.sum(probs, axis=-1), 1.0, atol=1e-3))
    print("KERNEL_OK")
</pallas_src>

<mosaic_0001>
module attributes {stable_mosaic.version = 11 : i64} {
  func.func @_proj_kernel(%arg0: i32, %arg1: i32, %arg2: i32, %arg3: memref<16x128xbf16, #tpu.memory_space<vmem>>, %arg4: memref<128x128xbf16, #tpu.memory_space<vmem>>, %arg5: memref<1x128xf32, #tpu.memory_space<vmem>>, %arg6: memref<16x128xf32, #tpu.memory_space<vmem>>, %arg7: memref<16x1xf32, #tpu.memory_space<vmem>>, %arg8: memref<16x1xf32, #tpu.memory_space<vmem>>, %arg9: memref<16x128xf32, #tpu.memory_space<vmem>>, %arg10: memref<16x1xf32, #tpu.memory_space<vmem>>, %arg11: memref<16x1xf32, #tpu.memory_space<vmem>>) attributes {dimension_semantics = [#tpu.dimension_semantics<parallel>, #tpu.dimension_semantics<arbitrary>, #tpu.dimension_semantics<arbitrary>], iteration_bounds = array<i64: 1, 3, 1>, scalar_prefetch = 0 : i64, scratch_operands = 3 : i64, tpu.core_type = #tpu.core_type<tc>, window_params = [{transform_indices = @transform_0, window_bounds = array<i64: 16, 128>}, {transform_indices = @transform_1, window_bounds = array<i64: 128, 128>}, {transform_indices = @transform_2, window_bounds = array<i64: 1, 128>}, {transform_indices = @transform_3, window_bounds = array<i64: 16, 128>}, {transform_indices = @transform_4, window_bounds = array<i64: 16, 1>}, {transform_indices = @transform_5, window_bounds = array<i64: 16, 1>}]} {
    %c0_i32 = arith.constant 0 : i32
    %0 = arith.cmpi eq, %arg2, %c0_i32 : i32
    %1 = arith.extui %0 : i1 to i32
    %c0_i32_0 = arith.constant 0 : i32
    %2 = arith.cmpi ne, %1, %c0_i32_0 : i32
    scf.if %2 {
      %cst_15 = arith.constant 0.000000e+00 : f32
      %22 = vector.broadcast %cst_15 : f32 to vector<16x128xf32>
      %c0_16 = arith.constant 0 : index
      %c0_17 = arith.constant 0 : index
      %23 = vector.load %arg9[%c0_16, %c0_17] : memref<16x128xf32, #tpu.memory_space<vmem>>, vector<16x128xf32>
      tpu.vector_store %arg9[%c0_16, %c0_17], %22 {strides = array<i32>} : memref<16x128xf32, #tpu.memory_space<vmem>>, vector<16x128xf32>,
    } else {
    }
    %c0 = arith.constant 0 : index
    %c0_1 = arith.constant 0 : index
    %3 = vector.load %arg9[%c0, %c0_1] : memref<16x128xf32, #tpu.memory_space<vmem>>, vector<16x128xf32>
    %c0_2 = arith.constant 0 : index
    %c0_3 = arith.constant 0 : index
    %4 = vector.load %arg3[%c0_2, %c0_3] : memref<16x128xbf16, #tpu.memory_space<vmem>>, vector<16x128xbf16>
    %c0_4 = arith.constant 0 : index
    %c0_5 = arith.constant 0 : index
    %5 = vector.load %arg4[%c0_4, %c0_5] : memref<128x128xbf16, #tpu.memory_space<vmem>>, vector<128x128xbf16>
    %cst = arith.constant dense<0.000000e+00> : vector<16x128xf32>
    %6 = tpu.matmul %4, %5, %cst {dimension_numbers = #tpu.dot_dimension_numbers<[1], [0], [0], [1], [0, 0, 1, 1], [], []>} : vector<16x128xbf16>, vector<128x128xbf16>, vector<16x128xf32> -> vector<16x128xf32>
    %7 = arith.addf %3, %6 : vector<16x128xf32>
    %c0_6 = arith.constant 0 : index
    %c0_7 = arith.constant 0 : index
    %8 = vector.load %arg9[%c0_6, %c0_7] : memref<16x128xf32, #tpu.memory_space<vmem>>, vector<16x128xf32>
    tpu.vector_store %arg9[%c0_6, %c0_7], %7 {strides = array<i32>} : memref<16x128xf32, #tpu.memory_space<vmem>>, vector<16x128xf32>,
    %c0_i32_8 = arith.constant 0 : i32
    %9 = arith.cmpi eq, %arg2, %c0_i32_8 : i32
    %c0_i32_9 = arith.constant 0 : i32
    %10 = arith.cmpi eq, %arg1, %c0_i32_9 : i32
    %11 = arith.andi %9, %10 : i1
    %12 = arith.extui %11 : i1 to i32
    %c0_i32_10 = arith.constant 0 : i32
    %13 = arith.cmpi ne, %12, %c0_i32_10 : i32
    scf.if %13 {
      %cst_15 = arith.constant 0xFF800000 : f32
      %22 = vector.broadcast %cst_15 : f32 to vector<16x1xf32>
      %c0_16 = arith.constant 0 : index
      %c0_17 = arith.constant 0 : index
      %23 = vector.load %arg10[%c0_16, %c0_17] : memref<16x1xf32, #tpu.memory_space<vmem>>, vector<16x1xf32>
      tpu.vector_store %arg10[%c0_16, %c0_17], %22 {strides = array<i32>} : memref<16x1xf32, #tpu.memory_space<vmem>>, vector<16x1xf32>,
      %cst_18 = arith.constant 0.000000e+00 : f32
      %24 = vector.broadcast %cst_18 : f32 to vector<16x1xf32>
      %c0_19 = arith.constant 0 : index
      %c0_20 = arith.constant 0 : index
      %25 = vector.load %arg11[%c0_19, %c0_20] : memref<16x1xf32, #tpu.memory_space<vmem>>, vector<16x1xf32>
      tpu.vector_store %arg11[%c0_19, %c0_20], %24 {strides = array<i32>} : memref<16x1xf32, #tpu.memory_space<vmem>>, vector<16x1xf32>,
    } else {
    }
    %c0_i32_11 = arith.constant 0 : i32
    %14 = arith.cmpi eq, %arg2, %c0_i32_11 : i32
    %15 = arith.extui %14 : i1 to i32
    %c0_i32_12 = arith.constant 0 : i32
    %16 = arith.cmpi ne, %15, %c0_i32_12 : i32
    scf.if %16 {
      %c0_15 = arith.constant 0 : index
      %c0_16 = arith.constant 0 : index
      %22 = vector.load %arg9[%c0_15, %c0_16] : memref<16x128xf32, #tpu.memory_space<vmem>>, vector<16x128xf32>
      %c0_17 = arith.constant 0 : index
      %c0_18 = arith.constant 0 : index
      %23 = vector.load %arg5[%c0_17, %c0_18] : memref<1x128xf32, #tpu.memory_space<vmem>>, vector<1x128xf32>
      %24 = vector.broadcast %23 : vector<1x128xf32> to vector<16x128xf32>
      %25 = arith.addf %22, %24 : vector<16x128xf32>
      %c0_19 = arith.constant 0 : index
      %c0_20 = arith.constant 0 : index
      %26 = vector.load %arg6[%c0_19, %c0_20] : memref<16x128xf32, #tpu.memory_space<vmem>>, vector<16x128xf32>
      tpu.vector_store %arg6[%c0_19, %c0_20], %25 {strides = array<i32>} : memref<16x128xf32, #tpu.memory_space<vmem>>, vector<16x128xf32>,
      %cst_21 = arith.constant dense<0xFF800000> : vector<16xf32>
      %27 = vector.multi_reduction <maximumf>, %25, %cst_21 [1] : vector<16x128xf32> to vector<16xf32>
      %28 = vector.shape_cast %27 : vector<16xf32> to vector<16x1xf32>
      %c0_22 = arith.constant 0 : index
      %c0_23 = arith.constant 0 : index
      %29 = vector.load %arg10[%c0_22, %c0_23] : memref<16x1xf32, #tpu.memory_space<vmem>>, vector<16x1xf32>
      %30 = arith.maximumf %29, %28 : vector<16x1xf32>
      %c0_24 = arith.constant 0 : index
      %c0_25 = arith.constant 0 : index
      %31 = vector.load %arg11[%c0_24, %c0_25] : memref<16x1xf32, #tpu.memory_space<vmem>>, vector<16x1xf32>
      %c0_26 = arith.constant 0 : index
      %c0_27 = arith.constant 0 : index
      %32 = vector.load %arg10[%c0_26, %c0_27] : memref<16x1xf32, #tpu.memory_space<vmem>>, vector<16x1xf32>
      %33 = arith.subf %32, %30 : vector<16x1xf32>
      %34 = math.exp %33 : vector<16x1xf32>
      %35 = arith.mulf %31, %34 : vector<16x1xf32>
      %36 = vector.broadcast %30 : vector<16x1xf32> to vector<16x128xf32>
      %37 = arith.subf %25, %36 : vector<16x128xf32>
      %38 = math.exp %37 : vector<16x128xf32>
      %cst_28 = arith.constant dense<0.000000e+00> : vector<16xf32>
      %39 = vector.multi_reduction <add>, %38, %cst_28 [1] : vector<16x128xf32> to vector<16xf32>
      %40 = vector.shape_cast %39 : vector<16xf32> to vector<16x1xf32>
      %41 = arith.addf %35, %40 : vector<16x1xf32>
      %c0_29 = arith.constant 0 : index
      %c0_30 = arith.constant 0 : index
      %42 = vector.load %arg11[%c0_29, %c0_30] : memref<16x1xf32, #tpu.memory_space<vmem>>, vector<16x1xf32>
      tpu.vector_store %arg11[%c0_29, %c0_30], %41 {strides = array<i32>} : memref<16x1xf32, #tpu.memory_space<vmem>>, vector<16x1xf32>,
      %c0_31 = arith.constant 0 : index
      %c0_32 = arith.constant 0 : index
      %43 = vector.load %arg10[%c0_31, %c0_32] : memref<16x1xf32, #tpu.memory_space<vmem>>, vector<16x1xf32>
      tpu.vector_store %arg10[%c0_31, %c0_32], %30 {strides = array<i32>} : memref<16x1xf32, #tpu.memory_space<vmem>>, vector<16x1xf32>,
    } else {
    }
    %c0_i32_13 = arith.constant 0 : i32
    %17 = arith.cmpi eq, %arg2, %c0_i32_13 : i32
    %c2_i32 = arith.constant 2 : i32
    %18 = arith.cmpi eq, %arg1, %c2_i32 : i32
    %19 = arith.andi %17, %18 : i1
    %20 = arith.extui %19 : i1 to i32
    %c0_i32_14 = arith.constant 0 : i32
    %21 = arith.cmpi ne, %20, %c0_i32_14 : i32
    scf.if %21 {
      %c0_15 = arith.constant 0 : index
      %c0_16 = arith.constant 0 : index
      %22 = vector.load %arg10[%c0_15, %c0_16] : memref<16x1xf32, #tpu.memory_space<vmem>>, vector<16x1xf32>
      %c0_17 = arith.constant 0 : index
      %c0_18 = arith.constant 0 : index
      %23 = vector.load %arg7[%c0_17, %c0_18] : memref<16x1xf32, #tpu.memory_space<vmem>>, vector<16x1xf32>
      tpu.vector_store %arg7[%c0_17, %c0_18], %22 {strides = array<i32>} : memref<16x1xf32, #tpu.memory_space<vmem>>, vector<16x1xf32>,
      %c0_19 = arith.constant 0 : index
      %c0_20 = arith.constant 0 : index
      %24 = vector.load %arg11[%c0_19, %c0_20] : memref<16x1xf32, #tpu.memory_space<vmem>>, vector<16x1xf32>
      %c0_21 = arith.constant 0 : index
      %c0_22 = arith.constant 0 : index
      %25 = vector.load %arg8[%c0_21, %c0_22] : memref<16x1xf32, #tpu.memory_space<vmem>>, vector<16x1xf32>
      tpu.vector_store %arg8[%c0_21, %c0_22], %24 {strides = array<i32>} : memref<16x1xf32, #tpu.memory_space<vmem>>, vector<16x1xf32>,
    } else {
    }
    return
  }
  func.func @transform_0(%arg0: i32, %arg1: i32, %arg2: i32) -> (i32, i32) {
    %c0_i32 = arith.constant 0 : i32
    return %arg0, %arg2 : i32, i32
  }
  func.func @transform_1(%arg0: i32, %arg1: i32, %arg2: i32) -> (i32, i32) {
    %c0_i32 = arith.constant 0 : i32
    return %arg2, %arg1 : i32, i32
  }
  func.func @transform_2(%arg0: i32, %arg1: i32, %arg2: i32) -> (i32, i32) {
    %c0_i32 = arith.constant 0 : i32
    %c0_i32_0 = arith.constant 0 : i32
    return %c0_i32, %arg1 : i32, i32
  }
  func.func @transform_3(%arg0: i32, %arg1: i32, %arg2: i32) -> (i32, i32) {
    %c0_i32 = arith.constant 0 : i32
    return %arg0, %arg1 : i32, i32
  }
  func.func @transform_4(%arg0: i32, %arg1: i32, %arg2: i32) -> (i32, i32) {
    %c0_i32 = arith.constant 0 : i32
    %c0_i32_0 = arith.constant 0 : i32
    return %arg0, %c0_i32 : i32, i32
  }
  func.func @transform_5(%arg0: i32, %arg1: i32, %arg2: i32) -> (i32, i32) {
    %c0_i32 = arith.constant 0 : i32
    %c0_i32_0 = arith.constant 0 : i32
    return %arg0, %c0_i32 : i32, i32
  }
}

</mosaic_0001>

<bundles_post_ra>
// kernel: tpu_custom_call.1
= control target key start
LH: loop header
LB: loop body
LE: loop exit
PB: predicated region body
PF: predicated region fallthrough
CT: control target
= control target key end

     0   :  { %11 = vsyncpa [#allocation6], 0  ;;  %s1366_s0 = inlined_call_operand.hbm [shape: bf16[16,128], index: 0, kind: input, shape index: {}]   ;;  %s1367_s1 = inlined_call_operand.hbm [shape: bf16[128,384], index: 1, kind: input, shape index: {}]   ;;  %s1368_s2 = inlined_call_operand.vmem [shape: f32[1,384], index: 2, kind: input, shape index: {}]   ;;  %s1369_s3 = inlined_call_operand.hbm [shape: f32[16,384], index: 3, kind: output, shape index: {0}]   ;;  %s1370_s4 = inlined_call_operand.vmem [shape: f32[16,1], index: 4, kind: output, shape index: {1}]   ;;  %s1371_s5 = inlined_call_operand.vmem [shape: f32[16,1], index: 5, kind: output, shape index: {2}]  }
   0x1   :  { %12 = vsyncpa [#allocation9], 0 }
   0x2   :  { %14 = vsyncpa [#allocation9 + $0x1], 0 }
   0x3   :  { %15 = vsyncpa [#allocation7], 0 }
   0x4   :  { %17 = vsyncpa [#allocation7 + $0x1], 0  ;;  %s1095_s18 = smov 0   ;;  %s1097_s19 = smov 0  }
   0x5   :  { %s1099_s20 = smov 0   ;;  %s1101_s21 = smov 0  }
   0x6   :  { %s1103_s22 = smov 0   ;;  %s1105_s23 = smov 0  }
   0x7 LB: > { %s740_s24 = sadd.s32 4294967295, %s1049_s23   ;;  %s741_s25 = sadd.s32 4294967294, %s1049_s23   ;;  %s1049_s23 = sphi %s1105_s23, %s23_s23   ;;  %s1045_s22 = sphi %s1103_s22, %s1403_s22   ;;  %s1041_s21 = sphi %s1101_s21, %s1402_s21   ;;  %s1037_s20 = sphi %s1099_s20, %s1401_s20   ;;  %s1033_s19 = sphi %s1097_s19, %s1400_s19   ;;  %s1029_s18 = sphi %s1095_s18, %s1399_s18  }
   0x8   : > { %p86_p0 = scmp.ne.s32.totalorder %s1037_s20, %s1033_s19  ;;  %p87_p1 = scmp.eq.s32.totalorder %s1049_s23, 0 }
   0x9   : > { %p92_p2 = scmp.ne.s32.totalorder %s1033_s19, %s1029_s18  ;;  %p1132_p3 = scmp.eq.s32.totalorder %s740_s24, 0 }
   0xa   : > { %p1136_p4 = por %p87_p1, %p86_p0  ;;  %p144_p5 = scmp.eq.s32.totalorder %s740_s24, 2 }
   0xb   : > { %s1381_s26 = scalar_select %p1132_p3, 1, 0 }
   0xc   : > { %p1142_p6 = por %p1132_p3, %p92_p2  ;;  %p150_p7 = scmp.eq.s32.totalorder %s741_s25, 2 }
   0xd   : > { %p1146_p8 = por %p144_p5, %p86_p0  ;;  %p742_p9 = scmp.ge.s32.totalorder %s1049_s23, 1 }
   0xe   : > { %s1383_s28 = scalar_select %p1142_p6, 1, 0 }
   0xf   : > { %s1384_s29 = scalar_select %p1146_p8, 1, 0 }
  0x10   : > { %p1151_p10 = por %p150_p7, %p92_p2  ;;  %p209_p11 = scmp.lt.s32.totalorder %s1049_s23, 4 }
  0x11   : > { %s1051_s7 = smov [#allocation5]   ;;  %p823_p0 = scmp.lt.s32.totalorder %s1049_s23, 3 }
  0x12   : > { %s1385_s30 = scalar_select %p1151_p10, 1, 0 }
  0x13   : > { %p1156_p12 = pnand %p742_p9, %p209_p11  ;;  %s225_s8 = sshll.u32 %s1051_s7, 4  ;;  %s226_s8 = int_to_ptr.vmem [resolvable:$true] %s225_s8 }
  0x14   : > { %1386 = sst [smem:[#allocation14_spill]] %s1385_s30  ;;  %p1171_p2 = pnand %p823_p0, %p1136_p4 }
  0x15   : > { %s1387_s6 = scalar_select %p1156_p12, 1, 0 }
  0x16   : > { %p810_p13 = pneg %p1156_p12  ;;  %s38_s11 = sadd.s32 1, %s1045_s22 }
  0x17   : > { %s1389_s10 = scalar_select %p1171_p2, 1, 0 }
  0x18   : > { %p1165_p1 = pnand %p810_p13, %p1132_p3  ;;  %s905_s14 = scalar_lea.hbm %s1366_s0, 128 }
  0x19   : > { %p906_p5 = scmp.ne.s32.totalorder %s1366_s0, %s905_s14  ;;  %p912_p4 = scmp.lt.u32.totalorder %s905_s14, %s1366_s0 }
  0x1a   : > { %p907_p7 = pneg %p1165_p1 }
  0x1c   : > { %p908_p9 = pnand %p907_p7, %p906_p5 }
  0x1e   : > { %p909_p11 = pneg %p908_p9 }
  0x20   : > { %p914_p13 = pnand %p912_p4, %p909_p11 }
  0x22   : > { %917 = shalt.err (!%p914_p13)
}
  0x23   : > { %s918_s25 = scalar_lea.vmem %s226_s8, 128  ;;  %p926_p6 = scmp.lt.s32.totalorder %s226_s8, %s226_s8 }
  0x24   : > { %p919_p0 = scmp.ne.s32.totalorder %s226_s8, %s918_s25  ;;  %p927_p3 = scmp.lt.s32.totalorder %s918_s25, %s918_s25 }
  0x26   : > { %p921_p10 = pnand %p919_p0, %p907_p7  ;;  %p928_p12 = por %p927_p3, %p926_p6 }
  0x28   : > { %p922_p8 = pneg %p921_p10 }
  0x2a   : > { %p929_p2 = pnand %p928_p12, %p922_p8 }
  0x2c   : > { %932 = shalt.err (!%p929_p2)
}
  0x2d   : > { %s1379_s27 = smov 64   ;;  %s1380_s7 = smov 4  }
  0x2e   : > { %813 = dma.hbm_to_vmem [thread:$0]  (!%p1165_p1), %s1366_s0, 128, %s226_s8, [#allocation6], %s1379_s27, %s1379_s27, %s1380_s7  }
  0x2f   : > { %p40_p10 = scmp.ge.s32.totalorder %s38_s11, 3  ;;  %s79_s14 = sadd.s32 1, %s1037_s20 }
  0x30   : > { %s239_s15 = sand.u32 1, %s1037_s20   ;;  %s746_s24 = sshll.u32 %s1045_s22, 6 }
  0x31   : > { %s1405_s11 = smov (%p40_p10, %s38_s11), 0  ;;  %s745_s16 = sshll.u32 %s239_s15, 6 }
  0x32   : > { %s75_s17 = ssub.s32 %s1045_s22, %s1405_s11  ;;  %s1205_s30 = scalar_lea.hbm %s1367_s1, %s746_s24 }
  0x33   : > { %p77_p3 = scmp.eq.s32.totalorder %s75_s17, 0  ;;  %s243_s8 = scalar_lea.vmem [#allocation8], %s745_s16 }
  0x34   : > { %s252_s12 = sshll.u32 %s243_s8, 4  ;;  %s1212_s27 = scalar_lea.sflag [#allocation9], %s239_s15  ;;  %s1210_s12 = int_to_ptr.vmem [resolvable:$true] %s252_s12 }
  0x35   : > { %s1208_s13 = scalar_select %p77_p3, %s1037_s20, %s79_s14  }
  0x36   : > { %s933_s7 = scalar_lea.hbm %s1205_s30, 1024  ;;  %p1390_p8 = scmp.ne.s32.totalorder %s1389_s10, 0 }
  0x37   : > { %p934_p6 = scmp.ne.s32.totalorder %s1205_s30, %s933_s7  ;;  %s938_s9 = scalar_lea.hbm %s1367_s1, 3072 }
  0x38   : > { %p935_p12 = pneg %p1390_p8  ;;  %p939_p5 = scmp.lt.u32.totalorder %s1205_s30, %s1367_s1 }
  0x39   : > { %p940_p7 = scmp.lt.u32.totalorder %s938_s9, %s933_s7  ;;  %p942_p11 = scmp.lt.u32.totalorder %s933_s7, %s1205_s30 }
  0x3a   : > { %p936_p1 = pnand %p935_p12, %p934_p6 }
  0x3b   : > { %p941_p9 = por %p940_p7, %p939_p5 }
  0x3c   : > { %p937_p2 = pneg %p936_p1 }
  0x3d   : > { %p943_p4 = por %p942_p11, %p941_p9 }
  0x3f   : > { %p944_p13 = pnand %p943_p4, %p937_p2 }
  0x41   : > { %947 = shalt.err (!%p944_p13)
}
  0x42   : > { %s948_s14 = scalar_lea.vmem %s1210_s12, 1024  ;;  %s1054_s15 = smov [#allocation8]  }
  0x43   : > { %p949_p0 = scmp.ne.s32.totalorder %s1210_s12, %s948_s14  ;;  %s953_s8 = sshll.u32 %s1054_s15, 4  ;;  %s954_s8 = int_to_ptr.vmem [resolvable:$false] %s953_s8 }
  0x44   : > { %s955_s17 = scalar_lea.vmem %s954_s8, 2048  ;;  %p956_p6 = scmp.lt.s32.totalorder %s1210_s12, %s954_s8 }
  0x45   : > { %p951_p10 = pnand %p949_p0, %p935_p12  ;;  %p957_p1 = scmp.lt.s32.totalorder %s955_s17, %s948_s14 }
  0x47   : > { %p952_p3 = pneg %p951_p10  ;;  %p958_p5 = por %p957_p1, %p956_p6 }
  0x49   : > { %p959_p7 = pnand %p958_p5, %p952_p3 }
  0x4b   : > { %962 = shalt.err (!%p959_p7)
}
  0x4c   : > { %s1055_s7 = smov 192   ;;  %s1391_s24 = smov 4  }
  0x4d   : > { %s1392_s9 = smov 64   ;;  %p1393_p12 = scmp.ne.s32.totalorder %s1387_s6, 0 }
  0x4e   : > { %817 = dma.hbm_to_vmem [thread:$0]  (!%p1390_p8), %s1205_s30, 1024, %s1210_s12, %s1212_s27, %s1055_s7, %s1392_s9, %s1391_s24  }
  0x4f   : > { %270 = sbr.rel (%p1393_p12) target bundleno = 817 (0x331), region = 32  ;;  %p1394_p2 = scmp.ne.s32.totalorder (!%p1393_p12), %s1381_s26, 0 }
  0x56   : > { %1016 = dma.done.wait (%p1394_p2), [#allocation6], 128  }
  0x57   : > { %1018 = vsyncadd (%p1394_p2), [#allocation6], 4294967168  ;;  %s1249_s16 = sand.u32 1, %s1033_s19   ;;  %p1395_p8 = scmp.ne.s32.totalorder %s1383_s28, 0 }
  0x58   : > { %s749_s10 = sshll.u32 %s1249_s16, 6  ;;  %s277_s25 = scalar_lea.sflag [#allocation9], %s1249_s16 }
  0x59   : > { %s1253_s14 = scalar_lea.vmem [#allocation8], %s749_s10 }
  0x5a   : > { %1020 = dma.done.wait (%p1395_p8), %s277_s25, 1024  }
  0x5b   : > { %1022 = vsyncadd (%p1395_p8), %s277_s25, 4294966272  ;;  %s750_s26 = sshll.u32 %s1249_s16, 4  ;;  %p322_p9 = scmp.lt.s32.totalorder %s1041_s21, 2  ;;  %v1056_v0 = vmov 0.0   ;;  %vm1057_vm0 = vmmov 0   ;;  %v886_v1 = vld [vmem:[%s1253_s14] sm:$0xff]  }
  0x5c   : > { %782 = vmatprep.subr.bf16.mxu0 %v1056_v0  ;;  %798 = vmatprep.mubr.msk.bf16.mxu0 %vm1057_vm0, %v1056_v0  ;;  %v887_v2 = vld [vmem:[%s1253_s14 + $0x8] sm:$0xff]   ;;  %v888_v3 = vld [vmem:[%s1253_s14 + $0x10] sm:$0xff]   ;;  %v889_v4 = vld [vmem:[%s1253_s14 + $0x18] sm:$0xff]   ;;  %p464_p11 = scmp.eq.s32.totalorder %s1041_s21, 0  ;;  %s1279_s12 = scalar_lea.vmem [#allocation10], %s750_s26 }
  0x5d   : > { %s1262_s30 = scalar_select %p322_p9, %s1041_s21, 2  ;;  %783 = vmatpush3.bf16.msra.mxu0 %v886_v1  ;;  %v890_v5 = vld [vmem:[%s1253_s14 + $0x20] sm:$0xff]   ;;  %v891_v6 = vld [vmem:[%s1253_s14 + $0x28] sm:$0xff]   ;;  %v892_v7 = vld [vmem:[%s1253_s14 + $0x30] sm:$0xff]  }
  0x5e   : > { %784 = vmatprep.subr.bf16.mxu0 %v1056_v0  ;;  %v893_v8 = vld [vmem:[%s1253_s14 + $0x38] sm:$0xff]   ;;  %vm469_vm1 = vcmask (%p464_p11), 7168   ;;  %v1058_v14 = vmov (%p464_p11), -inf   ;;  %v1059_v15 = vmov (%p464_p11), 0.0  }
  0x5f   : > { %s324_s27 = scalar_lea.vmem %s1368_s2, %s1262_s30  ;;  %v894_v9 = vld [vmem:[#allocation5] sm:$0xff]   ;;  %470 = vst.msk [vmem:[#allocation3] sm:$0xff] (%p464_p11), %vm469_vm1, %v1058_v14  ;;  %471 = vst.msk [vmem:[#allocation3 + $0x8] sm:$0xff] (%p464_p11), %vm469_vm1, %v1058_v14 }
  0x60   : > { %472 = vst.msk [vmem:[#allocation4] sm:$0xff] (%p464_p11), %vm469_vm1, %v1059_v15  ;;  %473 = vst.msk [vmem:[#allocation4 + $0x8] sm:$0xff] (%p464_p11), %vm469_vm1, %v1059_v15 }
  0x61   : > { %785 = vmatpush3.bf16.msra.mxu0 %v887_v2 }
  0x62   : > { %786 = vmatprep.subr.bf16.mxu0 %v1056_v0 }
  0x65   : > { %787 = vmatpush3.bf16.msra.mxu0 %v888_v3 }
  0x66   : > { %788 = vmatprep.subr.bf16.mxu0 %v1056_v0 }
  0x69   : > { %789 = vmatpush3.bf16.msra.mxu0 %v889_v4 }
  0x6a   : > { %790 = vmatprep.subr.bf16.mxu0 %v1056_v0 }
  0x6d   : > { %791 = vmatpush3.bf16.msra.mxu0 %v890_v5 }
  0x6e   : > { %792 = vmatprep.subr.bf16.mxu0 %v1056_v0 }
  0x71   : > { %793 = vmatpush3.bf16.msra.mxu0 %v891_v6 }
  0x72   : > { %794 = vmatprep.subr.bf16.mxu0 %v1056_v0 }
  0x75   : > { %795 = vmatpush3.bf16.msra.mxu0 %v892_v7 }
  0x76   : > { %796 = vmatprep.subr.bf16.mxu0 %v1056_v0 }
  0x79   : > { %797 = vmatpush3.bf16.msra.mxu0 %v893_v8 }
  0x7c   : > { %799 = vmatmul.mubr.bf16.vlgmr.msra.gmra.mrb[0].mxu0 %v894_v9 }
 0x14c   : > { %468 = sbr.rel (!%p464_p11) target bundleno = 339 (0x153), region = 48 }
 0x14f   : > { %v453_v10 = vpop.f32.mrb[0].mxu0 }
 0x150   : > { %v800_v11 = vpop.f32.mrb[1].mxu0  ;;  %462 = vst [vmem:[#allocation2] sm:$0xff] %v453_v10 }
 0x151   : > { %v456_v12 = vpop.f32.mrb[2].mxu0 }
 0x152   : > { %v801_v13 = vpop.f32.mrb[3].mxu0  ;;  %463 = vst [vmem:[#allocation2 + $0x8] sm:$0xff] %v456_v12 }
 0x153 PF: > { %v761_v17 = vld [vmem:[%s324_s27] ss:$0 sm:$0xff]  ;;  %v1060_v21 = vmov 0   ;;  %v494_v22 = vld [vmem:[#allocation3] sm:$0xff]  ;;  %vm530_vm2 = vcmask 7168   ;;  %v495_v25 = vld [vmem:[#allocation3 + $0x8] sm:$0xff] }
 0x154   : > { %895 = vset.pattern.permute.xlu1 %v1060_v21  ;;  %896 = vset.pattern.permute.xlu0 %v1060_v21  ;;  %p535_p4 = scmp.eq.s32.totalorder %s1041_s21, 2  ;;  %v498_v41 = vld [vmem:[#allocation4] sm:$0xff]  ;;  %v499_v45 = vld [vmem:[#allocation4 + $0x8] sm:$0xff] }
 0x157   : > { %v477_v16 = vld [vmem:[#allocation2] sm:$0xff] }
 0x158   : > { %v486_v19 = vadd.f32 %v761_v17, %v477_v16 }
 0x159   : > { %v478_v18 = vld [vmem:[#allocation2 + $0x8] sm:$0xff] }
 0x15a   : > { %v487_v20 = vadd.f32 %v761_v17, %v478_v18  ;;  %490 = vmax.xlane.f32.xlu0 %v486_v19  ;;  %488 = vst [vmem:[%s1279_s12] sm:$0xff] %v486_v19 }
 0x15c   : > { %489 = vst [vmem:[%s1279_s12 + $0x8] sm:$0xff] %v487_v20 }
 0x15e   : > { %492 = vmax.xlane.f32.xlu0 %v487_v20 }
 0x1e7   : > { %v491_v23 = vpop.xlane.xlu0 %490 }
 0x1e8   : > { %v496_v24 = vmax.f32 %v494_v22, %v491_v23 }
 0x1ea   : > { %v500_v26 = vsub.f32 %v494_v22, %v496_v24  ;;  %533 = vst.msk [vmem:[#allocation3] sm:$0xff] %vm530_vm2, %v496_v24  ;;  %510 = vperm.xlu1 %895, %v496_v24  }
 0x1eb   : > { %v493_v27 = vpop.xlane.xlu0 %492 }
 0x1ec   : > { %v497_v28 = vmax.f32 %v495_v25, %v493_v27  ;;  %v502_v38 = vmul.f32 1.442695, %v500_v26 }
 0x1ee   : > { %v501_v29 = vsub.f32 %v495_v25, %v497_v28  ;;  %534 = vst.msk [vmem:[#allocation3 + $0x8] sm:$0xff] %vm530_vm2, %v497_v28  ;;  %515 = vperm.xlu1 %895, %v497_v28  }
 0x1f0   : > { %v504_v39 = vmul.f32 1.442695, %v501_v29 }
 0x1f1   : > { %v540_v50 = vld [vmem:[#allocation3] sm:$0xff] (%p535_p4) }
 0x1f2   : > { %543 = vst.msk [vmem:[%s1370_s4] sm:$0xff] (%p535_p4), %vm530_vm2, %v540_v50 }
 0x1f5   : > { %v541_v51 = vld [vmem:[#allocation3 + $0x8] sm:$0xff] (%p535_p4) }
 0x1f6   : > { %544 = vst.msk [vmem:[%s1370_s4 + $0x8] sm:$0xff] (%p535_p4), %vm530_vm2, %v541_v51 }
 0x269   : > { %v511_v30 = vpop.permute.xlu1 %510 }
 0x26a   : > { %v518_v31 = vsub.f32 %v486_v19, %v511_v30 }
 0x26c   : > { %v520_v32 = vmul.f32 1.442695, %v518_v31 }
 0x26d   : > { %v516_v33 = vpop.permute.xlu1 %515 }
 0x26e   : > { %897 = vpow2.f32 %v520_v32  ;;  %v519_v34 = vsub.f32 %v487_v20, %v516_v33 }
 0x270   : > { %v522_v35 = vmul.f32 1.442695, %v519_v34 }
 0x272   : > { %899 = vpow2.f32 %v522_v35 }
 0x273   : > { %901 = vpow2.f32 %v502_v38 }
 0x274   : > { %903 = vpow2.f32 %v504_v39 }
 0x278   : > { %v898_v36 = vpop.eup %897 }
 0x279   : > { %524 = vadd.xlane.f32.xlu0 %v898_v36 }
 0x27c   : > { %v900_v37 = vpop.eup %899 }
 0x27d   : > { %526 = vadd.xlane.f32.xlu1 %v900_v37  ;;  %v902_v40 = vpop.eup %901 }
 0x27e   : > { %v506_v42 = vmul.f32 %v902_v40, %v498_v41  ;;  %v904_v43 = vpop.eup %903 }
 0x27f   : > { %v507_v47 = vmul.f32 %v904_v43, %v499_v45 }
 0x306   : > { %v525_v44 = vpop.xlane.xlu0 %524 }
 0x307   : > { %v528_v46 = vadd.f32 %v525_v44, %v506_v42  ;;  %539 = sbr.rel (!%p535_p4) target bundleno = 790 (0x316), region = 56 }
 0x309   : > { %531 = vst.msk [vmem:[#allocation4] sm:$0xff] %vm530_vm2, %v528_v46 }
 0x30a   : > { %v527_v48 = vpop.xlane.xlu1 %526 }
 0x30b   : > { %v529_v49 = vadd.f32 %v527_v48, %v507_v47 }
 0x30d   : > { %532 = vst.msk [vmem:[#allocation4 + $0x8] sm:$0xff] %vm530_vm2, %v529_v49 }
 0x310   : > { %v545_v52 = vld [vmem:[#allocation4] sm:$0xff] }
 0x311   : > { %547 = vst.msk [vmem:[%s1371_s5] sm:$0xff] %vm530_vm2, %v545_v52 }
 0x314   : > { %v546_v53 = vld [vmem:[#allocation4 + $0x8] sm:$0xff] }
 0x315   : > { %548 = vst.msk [vmem:[%s1371_s5 + $0x8] sm:$0xff] %vm530_vm2, %v546_v53 }
 0x316 PF: > { %s764_s30 = sshll.u32 %s1041_s21, 7  ;;  %s575_s15 = sshll.u32 %s1279_s12, 4  ;;  %s1318_s15 = int_to_ptr.vmem [resolvable:$true] %s575_s15 }
 0x317   : > { %s1315_s27 = scalar_lea.hbm %s1369_s3, %s764_s30  ;;  %s550_s8 = scalar_lea.sflag [#allocation7], %s1249_s16 }
 0x318   : > { %s963_s17 = scalar_lea.vmem %s1318_s15, 256  ;;  %p1396_p0 = scmp.ne.s32.totalorder %s1384_s29, 0 }
 0x319   : > { %p964_p13 = scmp.ne.s32.totalorder %s1318_s15, %s963_s17  ;;  %s1061_s7 = smov [#allocation10]  }
 0x31a   : > { %s967_s24 = sshll.u32 %s1061_s7, 4  ;;  %s968_s24 = int_to_ptr.vmem [resolvable:$false] %s967_s24 }
 0x31b   : > { %p965_p10 = pnand %p964_p13, %p1396_p0  ;;  %s969_s21 = scalar_lea.vmem %s968_s24, 512 }
 0x31c   : > { %p970_p6 = scmp.lt.s32.totalorder %s1318_s15, %s968_s24  ;;  %p971_p1 = scmp.lt.s32.totalorder %s969_s21, %s963_s17 }
 0x31d   : > { %p966_p3 = pneg %p965_p10 }
 0x31e   : > { %p972_p5 = por %p971_p1, %p970_p6 }
 0x320   : > { %p973_p7 = pnand %p972_p5, %p966_p3 }
 0x322   : > { %976 = shalt.err (!%p973_p7)
}
 0x323   : > { %s977_s12 = scalar_lea.hbm %s1315_s27, 256  ;;  %s981_s25 = scalar_lea.hbm %s1369_s3, 768 }
 0x324   : > { %p978_p12 = scmp.ne.s32.totalorder %s1315_s27, %s977_s12  ;;  %p982_p9 = scmp.lt.u32.totalorder %s1315_s27, %s1369_s3 }
 0x325   : > { %p983_p11 = scmp.lt.u32.totalorder %s981_s25, %s977_s12  ;;  %p985_p13 = scmp.lt.u32.totalorder %s977_s12, %s1315_s27 }
 0x326   : > { %p979_p2 = pnand %p978_p12, %p1396_p0 }
 0x327   : > { %p984_p4 = por %p983_p11, %p982_p9 }
 0x328   : > { %p980_p8 = pneg %p979_p2 }
 0x329   : > { %p986_p10 = por %p985_p13, %p984_p4 }
 0x32b   : > { %p987_p3 = pnand %p986_p10, %p980_p8 }
 0x32d   : > { %990 = shalt.err (!%p987_p3)
}
 0x32e   : > { %s1062_s30 = smov 128   ;;  %s1063_s6 = smov 384  }
 0x32f   : > { %s1064_s28 = smov 8  }
 0x330   : > { %808 = dma.vmem_to_hbm [thread:$0]  (%p1396_p0), %s1318_s15, 256, %s1315_s27, %s550_s8, %s1062_s30, %s1063_s6, %s1064_s28  }
 0x331 PF: > { %s1397_s17 = sld [smem:[#allocation14_spill]]  ;;  %p825_p6 = scmp.ge.s32.totalorder %s1049_s23, 2 }
 0x332   : > { %s614_s7 = sand.u32 1, %s1029_s18  }
 0x333   : > { %s615_s24 = scalar_lea.sflag [#allocation7], %s614_s7 }
 0x337   : > { %p1398_p1 = scmp.ne.s32.totalorder %s1397_s17, 0 }
 0x339   : > { %p819_p5 = pnand %p825_p6, %p1398_p1 }
 0x33b   : > { %1024 = dma.done.wait (!%p819_p5), %s615_s24, 256  }
 0x33c   : > { %1026 = vsyncadd (!%p819_p5), %s615_s24, 4294967040  ;;  %s23_s23 = sadd.s32 1, %s1049_s23   ;;  %s1399_s18 = smov %s1033_s19 }
 0x33d   : > { %p20_p7 = scmp.ge.s32.totalorder %s23_s23, 5   ;;  %s1400_s19 = smov %s1037_s20 }
 0x33e   : > { %s1401_s20 = smov %s1208_s13  ;;  %s1402_s21 = smov %s1045_s22 }
 0x33f   : > { %s1403_s22 = smov %s1405_s11  ;;  %22 = sbr.rel (!%p20_p7) target bundleno = 7 (0x7), region = 126 }
 0x346   :  { %620 = vsyncpa [#allocation6], 1 }
 0x347   :  { %622 = vsyncpa [#allocation6 + $0x1], 1 }
 0x348   :  { %623 = vsyncpa [#allocation9], 1 }
 0x349   :  { %625 = vsyncpa [#allocation9 + $0x1], 1 }
 0x34a   :  { %626 = vsyncpa [#allocation7], 1 }
 0x34b   :  { %628 = vsyncpa [#allocation7 + $0x1], 1 }

</bundles_post_ra>
